<compile_context>
chip_gen: v5e
topology: v5e:2x2
jax: 0.10.0
libtpu: 0.0.40
codegen_flags: <defaults>
</compile_context>

<pallas_src>
import jax
import jax.numpy as jnp
from jax.experimental import pallas as pl
from jax.experimental.pallas import tpu as pltpu


def _round_up(x, m):
    return (x + m - 1) // m * m


def image_adapter_kernel(x_ref, mask_ref, w1_ref, b1_ref, w2_ref, b2_ref, o_ref):
    # Gating in fp32 (sigmoid hits the EUP slot, effectively free).
    gate = jax.nn.sigmoid(mask_ref[...])                 # (1, H), broadcast over batch
    gx = x_ref[...].astype(jnp.float32) * gate           # sigmoid(mask) * feature

    # Two MXU matmuls: bf16 operands, fp32 accumulation; bias/ReLU in fp32.
    h = jnp.dot(gx.astype(jnp.bfloat16), w1_ref[...],
                preferred_element_type=jnp.float32) + b1_ref[...]
    h = jnp.maximum(h, 0.0)                              # ReLU
    y = jnp.dot(h.astype(jnp.bfloat16), w2_ref[...],
                preferred_element_type=jnp.float32) + b2_ref[...]

    o_ref[...] = (y + gx).astype(o_ref.dtype)            # residual with gated input (fp32)


def image_adapter(feature, mask, w1, b1, w2, b2, *, tb=256):
    """feature: [B, H]; mask/b1/b2: [H]; w1/w2: [H_in, H_out] (pre-transposed)."""
    B, H = feature.shape

    # Pad hidden dim to a lane-dense multiple of 128 (padded cols stay zero
    # through gate*0, matmul and residual, then get sliced off).
    Hp = _round_up(H, 128)
    if Hp != H:
        pad = Hp - H
        feature = jnp.pad(feature, ((0, 0), (0, pad)))
        mask = jnp.pad(mask, (0, pad))
        b1 = jnp.pad(b1, (0, pad))
        b2 = jnp.pad(b2, (0, pad))
        w1 = jnp.pad(w1, ((0, pad), (0, pad)))
        w2 = jnp.pad(w2, ((0, pad), (0, pad)))

    # Batch tile: multiple of 8 sublanes; don't over-pad tiny batches.
    tb = max(8, min(tb, _round_up(B, 8)))
    Bp = _round_up(B, tb)
    if Bp != B:
        feature = jnp.pad(feature, ((0, Bp - B), (0, 0)))

    feature = feature.astype(jnp.float32)
    mask2 = mask.reshape(1, Hp).astype(jnp.float32)
    b1_2 = b1.reshape(1, Hp).astype(jnp.float32)
    b2_2 = b2.reshape(1, Hp).astype(jnp.float32)
    w1_bf = w1.astype(jnp.bfloat16)                      # bf16 weights: half HBM traffic
    w2_bf = w2.astype(jnp.bfloat16)

    const_map = lambda i: (0, 0)
    single = pl.Buffered(1)                              # resident operands: no double buffer

    out = pl.pallas_call(
        image_adapter_kernel,
        out_shape=jax.ShapeDtypeStruct((Bp, Hp), jnp.float32),
        grid_spec=pltpu.PrefetchScalarGridSpec(
            num_scalar_prefetch=0,
            grid=(Bp // tb,),
            in_specs=[
                pl.BlockSpec((tb, Hp), lambda i: (i, 0)),                       # feature tile
                pl.BlockSpec((1, Hp), const_map, pipeline_mode=single),         # mask
                pl.BlockSpec((Hp, Hp), const_map, pipeline_mode=single),        # W1^T (bf16)
                pl.BlockSpec((1, Hp), const_map, pipeline_mode=single),         # b1
                pl.BlockSpec((Hp, Hp), const_map, pipeline_mode=single),        # W2^T (bf16)
                pl.BlockSpec((1, Hp), const_map, pipeline_mode=single),         # b2
            ],
            out_specs=pl.BlockSpec((tb, Hp), lambda i: (i, 0)),
        ),
        compiler_params=pltpu.CompilerParams(
            dimension_semantics=("parallel",),
            vmem_limit_bytes=48 * 1024 * 1024,
        ),
    )(feature, mask2, w1_bf, b1_2, w2_bf, b2_2)

    return out[:B, :H]


def image_adapter_ref(feature, mask, w1, b1, w2, b2):
    gate = jax.nn.sigmoid(mask)[None, :]
    gx = feature * gate
    h = jnp.maximum(gx @ w1 + b1[None, :], 0.0)
    y = h @ w2 + b2[None, :]
    return y + gx


if __name__ == "__main__":
    B, H = 16, 256  # small hidden_size stand-in for 1024
    key = jax.random.PRNGKey(0)
    k_x, k_w1, k_b1, k_w2, k_b2 = jax.random.split(key, 5)

    feature = jax.random.normal(k_x, (B, H), dtype=jnp.float32)
    # nn.Linear params (deterministic synthetic init); stored pre-transposed [H_in, H_out]
    w1 = jax.random.normal(k_w1, (H, H), dtype=jnp.float32) * 0.02
    b1 = jax.random.normal(k_b1, (H,), dtype=jnp.float32) * 0.02
    w2 = jax.random.normal(k_w2, (H, H), dtype=jnp.float32) * 0.02
    b2 = jax.random.normal(k_b2, (H,), dtype=jnp.float32) * 0.02
    # nn.Parameter(torch.zeros(hidden_size)) -> mask initialized to zeros
    mask = jnp.zeros((H,), dtype=jnp.float32)

    out = jax.block_until_ready(image_adapter(feature, mask, w1, b1, w2, b2))

    ref = image_adapter_ref(feature, mask, w1, b1, w2, b2)
    assert out.shape == (B, H)
    # bf16 matmul operands + fp32 accumulation/residual -> slightly loosened tolerance
    assert jnp.allclose(out, ref, atol=1e-2, rtol=1e-2), float(jnp.max(jnp.abs(out - ref)))
    print("KERNEL_OK")
</pallas_src>

<mosaic_0001>
module attributes {stable_mosaic.version = 11 : i64} {
  func.func @image_adapter_kernel(%arg0: i32, %arg1: memref<16x256xf32, #tpu.memory_space<vmem>>, %arg2: memref<1x256xf32, #tpu.memory_space<vmem>>, %arg3: memref<256x256xbf16, #tpu.memory_space<vmem>>, %arg4: memref<1x256xf32, #tpu.memory_space<vmem>>, %arg5: memref<256x256xbf16, #tpu.memory_space<vmem>>, %arg6: memref<1x256xf32, #tpu.memory_space<vmem>>, %arg7: memref<16x256xf32, #tpu.memory_space<vmem>>) attributes {dimension_semantics = [#tpu.dimension_semantics<parallel>], iteration_bounds = array<i64: 1>, scalar_prefetch = 0 : i64, scratch_operands = 0 : i64, tpu.core_type = #tpu.core_type<tc>, window_params = [{transform_indices = @transform_0, window_bounds = array<i64: 16, 256>}, {pipeline_mode = #tpu.pipeline_mode<synchronous>, transform_indices = @transform_1, window_bounds = array<i64: 1, 256>}, {pipeline_mode = #tpu.pipeline_mode<synchronous>, transform_indices = @transform_2, window_bounds = array<i64: 256, 256>}, {pipeline_mode = #tpu.pipeline_mode<synchronous>, transform_indices = @transform_3, window_bounds = array<i64: 1, 256>}, {pipeline_mode = #tpu.pipeline_mode<synchronous>, transform_indices = @transform_4, window_bounds = array<i64: 256, 256>}, {pipeline_mode = #tpu.pipeline_mode<synchronous>, transform_indices = @transform_5, window_bounds = array<i64: 1, 256>}, {transform_indices = @transform_6, window_bounds = array<i64: 16, 256>}]} {
    %c0 = arith.constant 0 : index
    %c0_0 = arith.constant 0 : index
    %0 = vector.load %arg2[%c0, %c0_0] : memref<1x256xf32, #tpu.memory_space<vmem>>, vector<1x256xf32>
    %1 = arith.negf %0 : vector<1x256xf32>
    %2 = math.exp %1 : vector<1x256xf32>
    %cst = arith.constant 1.000000e+00 : f32
    %3 = vector.broadcast %cst : f32 to vector<1x256xf32>
    %4 = arith.addf %3, %2 : vector<1x256xf32>
    %5 = arith.divf %3, %4 : vector<1x256xf32>
    %c0_1 = arith.constant 0 : index
    %c0_2 = arith.constant 0 : index
    %6 = vector.load %arg1[%c0_1, %c0_2] : memref<16x256xf32, #tpu.memory_space<vmem>>, vector<16x256xf32>
    %7 = vector.broadcast %5 : vector<1x256xf32> to vector<16x256xf32>
    %8 = arith.mulf %6, %7 : vector<16x256xf32>
    %9 = arith.truncf %8 : vector<16x256xf32> to vector<16x256xbf16>
    %c0_3 = arith.constant 0 : index
    %c0_4 = arith.constant 0 : index
    %10 = vector.load %arg3[%c0_3, %c0_4] : memref<256x256xbf16, #tpu.memory_space<vmem>>, vector<256x256xbf16>
    %cst_5 = arith.constant dense<0.000000e+00> : vector<16x256xf32>
    %11 = tpu.matmul %9, %10, %cst_5 {dimension_numbers = #tpu.dot_dimension_numbers<[1], [0], [0], [1], [0, 0, 1, 1], [], []>} : vector<16x256xbf16>, vector<256x256xbf16>, vector<16x256xf32> -> vector<16x256xf32>
    %c0_6 = arith.constant 0 : index
    %c0_7 = arith.constant 0 : index
    %12 = vector.load %arg4[%c0_6, %c0_7] : memref<1x256xf32, #tpu.memory_space<vmem>>, vector<1x256xf32>
    %13 = vector.broadcast %12 : vector<1x256xf32> to vector<16x256xf32>
    %14 = arith.addf %11, %13 : vector<16x256xf32>
    %cst_8 = arith.constant 0.000000e+00 : f32
    %15 = vector.broadcast %cst_8 : f32 to vector<16x256xf32>
    %16 = arith.maximumf %14, %15 : vector<16x256xf32>
    %17 = arith.truncf %16 : vector<16x256xf32> to vector<16x256xbf16>
    %c0_9 = arith.constant 0 : index
    %c0_10 = arith.constant 0 : index
    %18 = vector.load %arg5[%c0_9, %c0_10] : memref<256x256xbf16, #tpu.memory_space<vmem>>, vector<256x256xbf16>
    %cst_11 = arith.constant dense<0.000000e+00> : vector<16x256xf32>
    %19 = tpu.matmul %17, %18, %cst_11 {dimension_numbers = #tpu.dot_dimension_numbers<[1], [0], [0], [1], [0, 0, 1, 1], [], []>} : vector<16x256xbf16>, vector<256x256xbf16>, vector<16x256xf32> -> vector<16x256xf32>
    %c0_12 = arith.constant 0 : index
    %c0_13 = arith.constant 0 : index
    %20 = vector.load %arg6[%c0_12, %c0_13] : memref<1x256xf32, #tpu.memory_space<vmem>>, vector<1x256xf32>
    %21 = vector.broadcast %20 : vector<1x256xf32> to vector<16x256xf32>
    %22 = arith.addf %19, %21 : vector<16x256xf32>
    %23 = arith.addf %22, %8 : vector<16x256xf32>
    %c0_14 = arith.constant 0 : index
    %c0_15 = arith.constant 0 : index
    %24 = vector.load %arg7[%c0_14, %c0_15] : memref<16x256xf32, #tpu.memory_space<vmem>>, vector<16x256xf32>
    tpu.vector_store %arg7[%c0_14, %c0_15], %23 {strides = array<i32>} : memref<16x256xf32, #tpu.memory_space<vmem>>, vector<16x256xf32>,
    return
  }
  func.func @transform_0(%arg0: i32) -> (i32, i32) {
    %c0_i32 = arith.constant 0 : i32
    %c0_i32_0 = arith.constant 0 : i32
    return %arg0, %c0_i32 : i32, i32
  }
  func.func @transform_1(%arg0: i32) -> (i32, i32) {
    %c0_i32 = arith.constant 0 : i32
    %c0_i32_0 = arith.constant 0 : i32
    %c0_i32_1 = arith.constant 0 : i32
    return %c0_i32, %c0_i32_0 : i32, i32
  }
  func.func @transform_2(%arg0: i32) -> (i32, i32) {
    %c0_i32 = arith.constant 0 : i32
    %c0_i32_0 = arith.constant 0 : i32
    %c0_i32_1 = arith.constant 0 : i32
    return %c0_i32, %c0_i32_0 : i32, i32
  }
  func.func @transform_3(%arg0: i32) -> (i32, i32) {
    %c0_i32 = arith.constant 0 : i32
    %c0_i32_0 = arith.constant 0 : i32
    %c0_i32_1 = arith.constant 0 : i32
    return %c0_i32, %c0_i32_0 : i32, i32
  }
  func.func @transform_4(%arg0: i32) -> (i32, i32) {
    %c0_i32 = arith.constant 0 : i32
    %c0_i32_0 = arith.constant 0 : i32
    %c0_i32_1 = arith.constant 0 : i32
    return %c0_i32, %c0_i32_0 : i32, i32
  }
  func.func @transform_5(%arg0: i32) -> (i32, i32) {
    %c0_i32 = arith.constant 0 : i32
    %c0_i32_0 = arith.constant 0 : i32
    %c0_i32_1 = arith.constant 0 : i32
    return %c0_i32, %c0_i32_0 : i32, i32
  }
  func.func @transform_6(%arg0: i32) -> (i32, i32) {
    %c0_i32 = arith.constant 0 : i32
    %c0_i32_0 = arith.constant 0 : i32
    return %arg0, %c0_i32 : i32, i32
  }
}

</mosaic_0001>

<bundles_post_ra>
// kernel: tpu_custom_call.1
= control target key start
LH: loop header
LB: loop body
LE: loop exit
PB: predicated region body
PF: predicated region fallthrough
CT: control target
= control target key end

     0   :  { %11 = vsyncpa [#allocation3], 0  ;;  %s1212_s0 = inlined_call_operand.hbm [shape: f32[16,256], index: 0, kind: input, shape index: {}]   ;;  %s1213_s1 = inlined_call_operand.hbm [shape: f32[1,256], index: 1, kind: input, shape index: {}]   ;;  %s1214_s2 = inlined_call_operand.hbm [shape: bf16[256,256], index: 2, kind: input, shape index: {}]   ;;  %s1215_s3 = inlined_call_operand.vmem [shape: f32[1,256], index: 3, kind: input, shape index: {}]   ;;  %s1216_s4 = inlined_call_operand.hbm [shape: bf16[256,256], index: 4, kind: input, shape index: {}]   ;;  %s1217_s5 = inlined_call_operand.vmem [shape: f32[1,256], index: 5, kind: input, shape index: {}]   ;;  %s1218_s6 = inlined_call_operand.hbm [shape: f32[16,256], index: 6, kind: output, shape index: {}]  }
   0x1   :  { %12 = vsyncpa [#allocation6], 0 }
   0x2   :  { %13 = vsyncpa [#allocation9], 0  ;;  %s33_s23 = sshll.u32 %s1213_s1, 4  ;;  %s34_s23 = int_to_ptr.hbm [resolvable:$true] %s33_s23 }
   0x3   :  { %14 = vsyncpa [#allocation4], 0  ;;  %s1125_s24 = smov [#allocation5]   ;;  %s19_s28 = sshll.u32 %s1212_s0, 4  ;;  %s20_s28 = int_to_ptr.hbm [resolvable:$true] %s19_s28 }
   0x4   :  { %s35_s25 = sshll.u32 %s1125_s24, 4  ;;  %s1126_s29 = smov [#allocation2]   ;;  %s36_s25 = int_to_ptr.vmem [resolvable:$true] %s35_s25 }
   0x5   :  { %38 = dma.hbm_to_vmem [thread:$0]  %s34_s23, 32, %s36_s25, [#allocation6]  }
   0x6   :  { %s21_s30 = sshll.u32 %s1126_s29, 4  ;;  %s1127_s7 = smov 256   ;;  %s22_s30 = int_to_ptr.vmem [resolvable:$true] %s21_s30 }
   0x7   :  { %s1128_s8 = smov 16   ;;  %s43_s10 = sshll.u32 %s1214_s2, 4  ;;  %s44_s10 = int_to_ptr.hbm [resolvable:$true] %s43_s10 }
   0x8   :  { %27 = dma.hbm_to_vmem [thread:$0]  %s20_s28, 512, %s22_s30, [#allocation3], %s1127_s7, %s1127_s7, %s1128_s8  }
   0x9   :  { %s1129_s11 = smov [#allocation7]   ;;  %s58_s14 = sshll.u32 %s1216_s4, 4  ;;  %s59_s14 = int_to_ptr.hbm [resolvable:$true] %s58_s14 }
   0xa   :  { %s45_s12 = sshll.u32 %s1129_s11, 4  ;;  %s1130_s15 = smov 128   ;;  %s46_s12 = int_to_ptr.vmem [resolvable:$true] %s45_s12 }
   0xb   :  { %s1131_s16 = smov 8   ;;  %s1132_s17 = smov [#allocation8]  }
   0xc   :  { %51 = dma.hbm_to_vmem [thread:$0]  %s44_s10, 4096, %s46_s12, [#allocation6], %s1130_s15, %s1130_s15, %s1131_s16  }
   0xd   :  { %s60_s18 = sshll.u32 %s1132_s17, 4  ;;  %s61_s18 = int_to_ptr.vmem [resolvable:$true] %s60_s18 }
   0xe   :  { %66 = dma.hbm_to_vmem [thread:$0]  %s59_s14, 4096, %s61_s18, [#allocation9], %s1130_s15, %s1130_s15, %s1131_s16  }
   0xf   :  { %1117 = dma.done.wait [#allocation3], 512  }
  0x10   :  { %1118 = vsyncadd [#allocation3], 4294966784 }
  0x11   :  { %1119 = dma.done.wait [#allocation6], 4128  }
  0x12   :  { %1120 = vsyncadd [#allocation6], 4294963168 }
  0x13   :  { %1121 = dma.done.wait [#allocation9], 4096  }
  0x14   :  { %1122 = vsyncadd [#allocation9], 4294963200  ;;  %v722_v0 = vld [vmem:[#allocation7 + $0x70] sm:$0xf]  ;;  %v935_v1 = vld [vmem:[#allocation7 + $0x74] sm:$0xf0] }
  0x15   :  { %v786_v2 = vld [vmem:[#allocation7 + $0xf0] sm:$0xf]  ;;  %v723_v3 = vor.u32 %v935_v1, %v722_v0  ;;  %v951_v4 = vld [vmem:[#allocation7 + $0xf4] sm:$0xf0]  ;;  %v934_v5 = vld [vmem:[#allocation7 + $0x74] sm:$0xf] }
  0x16   :  { %v724_v6 = vld [vmem:[#allocation7 + $0x78] sm:$0xf0]  ;;  %v787_v7 = vor.u32 %v951_v4, %v786_v2  ;;  %v950_v9 = vld [vmem:[#allocation7 + $0xf4] sm:$0xf]  ;;  %v714_v11 = vld [vmem:[#allocation7 + $0x60] sm:$0xf] }
  0x17   :  { %v727_v8 = vor.u32 %v934_v5, %v724_v6  ;;  %v788_v10 = vld [vmem:[#allocation7 + $0xf8] sm:$0xf0]  ;;  %318 = vmatpush.bf16.msra.mxu0 %v723_v3  ;;  %v933_v13 = vld [vmem:[#allocation7 + $0x64] sm:$0xf0]  ;;  %v778_v14 = vld [vmem:[#allocation7 + $0xe0] sm:$0xf] }
  0x18   :  { %v791_v12 = vor.u32 %v950_v9, %v788_v10  ;;  %v949_v15 = vld [vmem:[#allocation7 + $0xe4] sm:$0xf0]  ;;  %332 = vmatpush.bf16.msra.mxu1 %v787_v7  ;;  %v715_v16 = vor.u32 %v933_v13, %v714_v11  ;;  %v932_v18 = vld [vmem:[#allocation7 + $0x64] sm:$0xf]  ;;  %v716_v19 = vld [vmem:[#allocation7 + $0x68] sm:$0xf0] }
  0x19   :  { %346 = vmatpush.bf16.msra.mxu2 %v727_v8  ;;  %v779_v17 = vor.u32 %v949_v15, %v778_v14  ;;  %v948_v20 = vld [vmem:[#allocation7 + $0xe4] sm:$0xf]  ;;  %v719_v21 = vor.u32 %v932_v18, %v716_v19  ;;  %v780_v22 = vld [vmem:[#allocation7 + $0xe8] sm:$0xf0]  ;;  %v706_v23 = vld [vmem:[#allocation7 + $0x50] sm:$0xf] }
  0x1a   :  { %360 = vmatpush.bf16.msra.mxu3 %v791_v12  ;;  %v931_v24 = vld [vmem:[#allocation7 + $0x54] sm:$0xf0]  ;;  %v783_v25 = vor.u32 %v948_v20, %v780_v22  ;;  %v770_v26 = vld [vmem:[#allocation7 + $0xd0] sm:$0xf]  ;;  %v930_v28 = vld [vmem:[#allocation7 + $0x54] sm:$0xf] }
  0x1b   :  { %v947_v27 = vld [vmem:[#allocation7 + $0xd4] sm:$0xf0]  ;;  %319 = vmatpush.bf16.msra.mxu0 %v715_v16  ;;  %v707_v29 = vor.u32 %v931_v24, %v706_v23  ;;  %v708_v30 = vld [vmem:[#allocation7 + $0x58] sm:$0xf0]  ;;  %v946_v31 = vld [vmem:[#allocation7 + $0xd4] sm:$0xf] }
  0x1c   :  { %v772_v32 = vld [vmem:[#allocation7 + $0xd8] sm:$0xf0]  ;;  %333 = vmatpush.bf16.msra.mxu1 %v779_v17  ;;  %v771_v33 = vor.u32 %v947_v27, %v770_v26  ;;  %v711_v34 = vor.u32 %v930_v28, %v708_v30  ;;  %v698_v35 = vld [vmem:[#allocation7 + $0x40] sm:$0xf]  ;;  %v929_v36 = vld [vmem:[#allocation7 + $0x44] sm:$0xf0] }
  0x1d   :  { %347 = vmatpush.bf16.msra.mxu2 %v719_v21  ;;  %v762_v37 = vld [vmem:[#allocation7 + $0xc0] sm:$0xf]  ;;  %v775_v38 = vor.u32 %v946_v31, %v772_v32  ;;  %v945_v39 = vld [vmem:[#allocation7 + $0xc4] sm:$0xf0]  ;;  %v928_v40 = vld [vmem:[#allocation7 + $0x44] sm:$0xf]  ;;  %v699_v44 = vor.u32 %v929_v36, %v698_v35 }
  0x1e   :  { %361 = vmatpush.bf16.msra.mxu3 %v783_v25  ;;  %v700_v41 = vld [vmem:[#allocation7 + $0x48] sm:$0xf0]  ;;  %v944_v42 = vld [vmem:[#allocation7 + $0xc4] sm:$0xf]  ;;  %v763_v45 = vor.u32 %v945_v39, %v762_v37  ;;  %v690_v47 = vld [vmem:[#allocation7 + $0x30] sm:$0xf] }
  0x1f   :  { %v764_v43 = vld [vmem:[#allocation7 + $0xc8] sm:$0xf0]  ;;  %320 = vmatpush.bf16.msra.mxu0 %v707_v29  ;;  %v703_v46 = vor.u32 %v928_v40, %v700_v41  ;;  %v927_v48 = vld [vmem:[#allocation7 + $0x34] sm:$0xf0]  ;;  %v754_v49 = vld [vmem:[#allocation7 + $0xb0] sm:$0xf] }
  0x20   :  { %334 = vmatpush.bf16.msra.mxu1 %v771_v33  ;;  %v767_v50 = vor.u32 %v944_v42, %v764_v43  ;;  %v943_v51 = vld [vmem:[#allocation7 + $0xb4] sm:$0xf0]  ;;  %v926_v52 = vld [vmem:[#allocation7 + $0x34] sm:$0xf]  ;;  %v692_v53 = vld [vmem:[#allocation7 + $0x38] sm:$0xf0]  ;;  %v691_v56 = vor.u32 %v927_v48, %v690_v47 }
  0x21   :  { %348 = vmatpush.bf16.msra.mxu2 %v711_v34  ;;  %v942_v54 = vld [vmem:[#allocation7 + $0xb4] sm:$0xf]  ;;  %v756_v55 = vld [vmem:[#allocation7 + $0xb8] sm:$0xf0]  ;;  %v755_v57 = vor.u32 %v943_v51, %v754_v49  ;;  %v695_v58 = vor.u32 %v926_v52, %v692_v53  ;;  %v682_v59 = vld [vmem:[#allocation7 + $0x20] sm:$0xf] }
  0x22   :  { %362 = vmatpush.bf16.msra.mxu3 %v775_v38  ;;  %v925_v60 = vld [vmem:[#allocation7 + $0x24] sm:$0xf0]  ;;  %v746_v61 = vld [vmem:[#allocation7 + $0xa0] sm:$0xf]  ;;  %v759_v62 = vor.u32 %v942_v54, %v756_v55  ;;  %v924_v0 = vld [vmem:[#allocation7 + $0x24] sm:$0xf] }
  0x23   :  { %321 = vmatpush.bf16.msra.mxu0 %v699_v44  ;;  %v941_v63 = vld [vmem:[#allocation7 + $0xa4] sm:$0xf0]  ;;  %v684_v1 = vld [vmem:[#allocation7 + $0x28] sm:$0xf0]  ;;  %v940_v2 = vld [vmem:[#allocation7 + $0xa4] sm:$0xf]  ;;  %v683_v4 = vor.u32 %v925_v60, %v682_v59 }
  0x24   :  { %335 = vmatpush.bf16.msra.mxu1 %v763_v45  ;;  %v748_v3 = vld [vmem:[#allocation7 + $0xa8] sm:$0xf0]  ;;  %v674_v5 = vld [vmem:[#allocation7 + $0x10] sm:$0xf]  ;;  %v747_v6 = vor.u32 %v941_v63, %v746_v61  ;;  %v687_v7 = vor.u32 %v924_v0, %v684_v1  ;;  %v923_v8 = vld [vmem:[#allocation7 + $0x14] sm:$0xf0] }
  0x25   :  { %349 = vmatpush.bf16.msra.mxu2 %v703_v46  ;;  %v738_v9 = vld [vmem:[#allocation7 + $0x90] sm:$0xf]  ;;  %v939_v10 = vld [vmem:[#allocation7 + $0x94] sm:$0xf0]  ;;  %v751_v11 = vor.u32 %v940_v2, %v748_v3  ;;  %v922_v12 = vld [vmem:[#allocation7 + $0x14] sm:$0xf]  ;;  %v675_v18 = vor.u32 %v923_v8, %v674_v5 }
  0x26   :  { %363 = vmatpush.bf16.msra.mxu3 %v767_v50  ;;  %v676_v13 = vld [vmem:[#allocation7 + $0x18] sm:$0xf0]  ;;  %v938_v15 = vld [vmem:[#allocation7 + $0x94] sm:$0xf]  ;;  %v666_v19 = vld [vmem:[#allocation7] sm:$0xf]  ;;  %v739_v20 = vor.u32 %v939_v10, %v738_v9 }
  0x27   :  { %322 = vmatpush.bf16.msra.mxu0 %v691_v56  ;;  %v85_v14 = vld [vmem:[#allocation5] sm:$0x3]  ;;  %v679_v21 = vor.u32 %v922_v12, %v676_v13  ;;  %v921_v22 = vld [vmem:[#allocation7 + $0x4] sm:$0xf0]  ;;  %v730_v23 = vld [vmem:[#allocation7 + $0x80] sm:$0xf] }
  0x28   :  { %336 = vmatpush.bf16.msra.mxu1 %v755_v57  ;;  %v740_v16 = vld [vmem:[#allocation7 + $0x98] sm:$0xf0]  ;;  %v663_v17 = vmul.f32 -1.442695, %v85_v14  ;;  %v937_v24 = vld [vmem:[#allocation7 + $0x84] sm:$0xf0]  ;;  %v667_v32 = vor.u32 %v921_v22, %v666_v19 }
  0x29   :  { %350 = vmatpush.bf16.msra.mxu2 %v695_v58  ;;  %v743_v25 = vor.u32 %v938_v15, %v740_v16  ;;  %v920_v26 = vld [vmem:[#allocation7 + $0x4] sm:$0xf]  ;;  %v668_v27 = vld [vmem:[#allocation7 + $0x8] sm:$0xf0]  ;;  %v850_v30 = vld [vmem:[#allocation8 + $0x70] sm:$0xf]  ;;  %v731_v36 = vor.u32 %v937_v24, %v730_v23 }
  0x2a   :  { %364 = vmatpush.bf16.msra.mxu3 %v759_v62  ;;  %993 = vpow2.f32 %v663_v17  ;;  %v936_v28 = vld [vmem:[#allocation7 + $0x84] sm:$0xf]  ;;  %v732_v29 = vld [vmem:[#allocation7 + $0x88] sm:$0xf0]  ;;  %v967_v31 = vld [vmem:[#allocation8 + $0x74] sm:$0xf0]  ;;  %v671_v37 = vor.u32 %v920_v26, %v668_v27 }
  0x2b   :  { %323 = vmatpush.bf16.msra.mxu0 %v683_v4  ;;  %v966_v33 = vld [vmem:[#allocation8 + $0x74] sm:$0xf]  ;;  %v852_v34 = vld [vmem:[#allocation8 + $0x78] sm:$0xf0]  ;;  %v914_v35 = vld [vmem:[#allocation8 + $0xf0] sm:$0xf]  ;;  %v735_v41 = vor.u32 %v936_v28, %v732_v29  ;;  %v851_v42 = vor.u32 %v967_v31, %v850_v30 }
  0x2c   :  { %337 = vmatpush.bf16.msra.mxu1 %v747_v6  ;;  %v983_v38 = vld [vmem:[#allocation8 + $0xf4] sm:$0xf0]  ;;  %v982_v39 = vld [vmem:[#allocation8 + $0xf4] sm:$0xf]  ;;  %v916_v40 = vld [vmem:[#allocation8 + $0xf8] sm:$0xf0]  ;;  %v855_v45 = vor.u32 %v966_v33, %v852_v34 }
  0x2d   :  { %351 = vmatpush.bf16.msra.mxu2 %v687_v7  ;;  %v842_v43 = vld [vmem:[#allocation8 + $0x60] sm:$0xf]  ;;  %v965_v46 = vld [vmem:[#allocation8 + $0x64] sm:$0xf0]  ;;  %v964_v47 = vld [vmem:[#allocation8 + $0x64] sm:$0xf]  ;;  %v915_v49 = vor.u32 %v983_v38, %v914_v35  ;;  %v919_v51 = vor.u32 %v982_v39, %v916_v40 }
  0x2e   :  { %365 = vmatpush.bf16.msra.mxu3 %v751_v11  ;;  %v844_v48 = vld [vmem:[#allocation8 + $0x68] sm:$0xf0]  ;;  %v906_v52 = vld [vmem:[#allocation8 + $0xe0] sm:$0xf]  ;;  %v981_v53 = vld [vmem:[#allocation8 + $0xe4] sm:$0xf0]  ;;  %v843_v56 = vor.u32 %v965_v46, %v842_v43 }
  0x2f   :  { %324 = vmatpush.bf16.msra.mxu0 %v675_v18  ;;  %v980_v54 = vld [vmem:[#allocation8 + $0xe4] sm:$0xf]  ;;  %v908_v55 = vld [vmem:[#allocation8 + $0xe8] sm:$0xf0]  ;;  %v847_v57 = vor.u32 %v964_v47, %v844_v48  ;;  %v834_v58 = vld [vmem:[#allocation8 + $0x50] sm:$0xf]  ;;  %v907_v60 = vor.u32 %v981_v53, %v906_v52 }
  0x30   :  { %338 = vmatpush.bf16.msra.mxu1 %v739_v20  ;;  %v994_v44 = vpop.eup %993  ;;  %v963_v59 = vld [vmem:[#allocation8 + $0x54] sm:$0xf0]  ;;  %v962_v61 = vld [vmem:[#allocation8 + $0x54] sm:$0xf]  ;;  %v836_v62 = vld [vmem:[#allocation8 + $0x58] sm:$0xf0]  ;;  %v911_v63 = vor.u32 %v980_v54, %v908_v55 }
  0x31   :  { %352 = vmatpush.bf16.msra.mxu2 %v679_v21  ;;  %v89_v50 = vadd.f32 1.0, %v994_v44  ;;  %v835_v0 = vor.u32 %v963_v59, %v834_v58  ;;  %v839_v1 = vor.u32 %v962_v61, %v836_v62  ;;  %v826_v2 = vld [vmem:[#allocation8 + $0x40] sm:$0xf]  ;;  %v961_v3 = vld [vmem:[#allocation8 + $0x44] sm:$0xf0]  ;;  %v107_v19 = vld [vmem:[#allocation2 + $0x10] sm:$0xff] }
  0x32   :  { %366 = vmatpush.bf16.msra.mxu3 %v743_v25  ;;  %v960_v5 = vld [vmem:[#allocation8 + $0x44] sm:$0xf]  ;;  %v828_v6 = vld [vmem:[#allocation8 + $0x48] sm:$0xf0]  ;;  %v827_v9 = vor.u32 %v961_v3, %v826_v2  ;;  %v108_v21 = vld [vmem:[#allocation2 + $0x18] sm:$0xff]  ;;  %s648_s23 = sshll.u32 %s1218_s6, 4  ;;  %s649_s23 = int_to_ptr.hbm [resolvable:$true] %s648_s23 }
  0x33   :  { %325 = vmatpush.bf16.msra.mxu0 %v667_v32  ;;  %995 = vrcp.f32 %v89_v50  ;;  %vm95_vm0 = vweird.f32 %v89_v50  ;;  %v101_v8 = vand.u32 2147483648, %v89_v50  ;;  %v99_v11 = vand.u32 2147483647, %v89_v50  ;;  %v105_v17 = vld [vmem:[#allocation2] sm:$0xff]  ;;  %v106_v20 = vld [vmem:[#allocation2 + $0x8] sm:$0xff] }
  0x34   :  { %339 = vmatpush.bf16.msra.mxu1 %v731_v36  ;;  %v831_v12 = vor.u32 %v960_v5, %v828_v6  ;;  %v898_v30 = vld [vmem:[#allocation8 + $0xd0] sm:$0xf]  ;;  %v979_v31 = vld [vmem:[#allocation8 + $0xd4] sm:$0xf0]  ;;  %v978_v32 = vld [vmem:[#allocation8 + $0xd4] sm:$0xf] }
  0x35   :  { %353 = vmatpush.bf16.msra.mxu2 %v671_v37  ;;  %v102_v14 = vor.u32 1.1754944e-38, %v101_v8  ;;  %vm100_vm3 = vcmp.eq.f32.partialorder %v99_v11, 8.507059e+37  ;;  %v899_v33 = vor.u32 %v979_v31, %v898_v30  ;;  %v900_v34 = vld [vmem:[#allocation8 + $0xd8] sm:$0xf0]  ;;  %v818_v36 = vld [vmem:[#allocation8 + $0x30] sm:$0xf] }
  0x36   :  { %367 = vmatpush.bf16.msra.mxu3 %v735_v41  ;;  %v903_v35 = vor.u32 %v978_v32, %v900_v34  ;;  %v959_v37 = vld [vmem:[#allocation8 + $0x34] sm:$0xf0]  ;;  %v958_v38 = vld [vmem:[#allocation8 + $0x34] sm:$0xf]  ;;  %v820_v40 = vld [vmem:[#allocation8 + $0x38] sm:$0xf0] }
  0x37   :  { %578 = vmatpush.bf16.msrb.mxu0 %v851_v42  ;;  %v819_v39 = vor.u32 %v959_v37, %v818_v36  ;;  %v823_v41 = vor.u32 %v958_v38, %v820_v40  ;;  %v890_v42 = vld [vmem:[#allocation8 + $0xc0] sm:$0xf]  ;;  %v977_v43 = vld [vmem:[#allocation8 + $0xc4] sm:$0xf0]  ;;  %v976_v44 = vld [vmem:[#allocation8 + $0xc4] sm:$0xf] }
  0x38   :  { %592 = vmatpush.bf16.msrb.mxu1 %v915_v49  ;;  %v892_v46 = vld [vmem:[#allocation8 + $0xc8] sm:$0xf0]  ;;  %v810_v48 = vld [vmem:[#allocation8 + $0x20] sm:$0xf]  ;;  %v957_v49 = vld [vmem:[#allocation8 + $0x24] sm:$0xf0] }
  0x39   :  { %606 = vmatpush.bf16.msrb.mxu2 %v855_v45  ;;  %v996_v4 = vpop.eup %995  ;;  %v891_v45 = vor.u32 %v977_v43, %v890_v42  ;;  %v895_v47 = vor.u32 %v976_v44, %v892_v46  ;;  %v812_v52 = vld [vmem:[#allocation8 + $0x28] sm:$0xf0]  ;;  %v882_v54 = vld [vmem:[#allocation8 + $0xb0] sm:$0xf]  ;;  %v975_v55 = vld [vmem:[#allocation8 + $0xb4] sm:$0xf0] }
  0x3a   :  { %620 = vmatpush.bf16.msrb.mxu3 %v919_v51  ;;  %v91_v7 = vmul.f32 %v996_v4, %v89_v50  ;;  %vm96_vm1 = vweird.f32 %v996_v4  ;;  %v956_v50 = vld [vmem:[#allocation8 + $0x24] sm:$0xf]  ;;  %v811_v51 = vor.u32 %v957_v49, %v810_v48  ;;  %v884_v58 = vld [vmem:[#allocation8 + $0xb8] sm:$0xf0]  ;;  %v955_v61 = vld [vmem:[#allocation8 + $0x14] sm:$0xf0] }
  0x3b   :  { %579 = vmatpush.bf16.msrb.mxu0 %v843_v56  ;;  %vm97_vm2 = vmor %vm95_vm0, %vm96_vm1  ;;  %v815_v53 = vor.u32 %v956_v50, %v812_v52  ;;  %v974_v56 = vld [vmem:[#allocation8 + $0xb4] sm:$0xf]  ;;  %v874_v2 = vld [vmem:[#allocation8 + $0xa0] sm:$0xf] }
  0x3c   :  { %593 = vmatpush.bf16.msrb.mxu1 %v907_v60  ;;  %v92_v10 = vsub.f32 1.0, %v91_v7  ;;  %v887_v59 = vor.u32 %v974_v56, %v884_v58  ;;  %v802_v60 = vld [vmem:[#allocation8 + $0x10] sm:$0xf]  ;;  %v954_v62 = vld [vmem:[#allocation8 + $0x14] sm:$0xf] }
  0x3d   :  { %607 = vmatpush.bf16.msrb.mxu2 %v847_v57  ;;  %v883_v57 = vor.u32 %v975_v55, %v882_v54  ;;  %v973_v3 = vld [vmem:[#allocation8 + $0xa4] sm:$0xf0]  ;;  %v876_v6 = vld [vmem:[#allocation8 + $0xa8] sm:$0xf0]  ;;  %v794_v8 = vld [vmem:[#allocation8] sm:$0xf] }
  0x3e   :  { %621 = vmatpush.bf16.msrb.mxu3 %v911_v63  ;;  %v93_v13 = vmul.f32 %v996_v4, %v92_v10  ;;  %v803_v63 = vor.u32 %v955_v61, %v802_v60  ;;  %v875_v5 = vor.u32 %v973_v3, %v874_v2  ;;  %v952_v10 = vld [vmem:[#allocation8 + $0x4] sm:$0xf]  ;;  %v152_v30 = vld [vmem:[%s1215_s3] sm:$0x3] }
  0x3f   :  { %580 = vmatpush.bf16.msrb.mxu0 %v835_v0  ;;  %v804_v0 = vld [vmem:[#allocation8 + $0x18] sm:$0xf0]  ;;  %v155_v37 = vperm.slane %v152_v30, 1 }
  0x40   :  { %v94_v15 = vadd.f32 %v996_v4, %v93_v13  ;;  %594 = vmatpush.bf16.msrb.mxu1 %v899_v33  ;;  %v154_v33 = vperm.slane %v152_v30, 0  ;;  %v412_v55 = vld [vmem:[%s1217_s5] sm:$0x3]  ;;  %s1133_s5 = smov [#allocation10]  }
  0x41   :  { %608 = vmatpush.bf16.msrb.mxu2 %v839_v1  ;;  %v807_v1 = vor.u32 %v954_v62, %v804_v0  ;;  %v415_v62 = vperm.slane %v412_v55, 1  ;;  %s646_s20 = sshll.u32 %s1133_s5, 4  ;;  %s647_s20 = int_to_ptr.vmem [resolvable:$true] %s646_s20 }
  0x42   :  { %v98_v16 = vsel %vm97_vm2, %v996_v4, %v94_v15  ;;  %622 = vmatpush.bf16.msrb.mxu3 %v903_v35  ;;  %v972_v4 = vld [vmem:[#allocation8 + $0xa4] sm:$0xf]  ;;  %v971_v15 = vld [vmem:[#allocation8 + $0x94] sm:$0xf0] }
  0x43   :  { %581 = vmatpush.bf16.msrb.mxu0 %v827_v9  ;;  %v103_v18 = vsel %vm100_vm3, %v102_v14, %v98_v16  ;;  %v879_v7 = vor.u32 %v972_v4, %v876_v6  ;;  %v953_v9 = vld [vmem:[#allocation8 + $0x4] sm:$0xf0]  ;;  %v866_v14 = vld [vmem:[#allocation8 + $0x90] sm:$0xf]  ;;  %v970_v16 = vld [vmem:[#allocation8 + $0x94] sm:$0xf] }
  0x44   :  { %v110_v22 = vperm.slane %v103_v18, 0  ;;  %v111_v23 = vperm.slane %v103_v18, 1  ;;  %595 = vmatpush.bf16.msrb.mxu1 %v891_v45  ;;  %v795_v11 = vor.u32 %v953_v9, %v794_v8  ;;  %v868_v18 = vld [vmem:[#allocation8 + $0x98] sm:$0xf0] }
  0x45   :  { %609 = vmatpush.bf16.msrb.mxu2 %v831_v12  ;;  %v796_v12 = vld [vmem:[#allocation8 + $0x8] sm:$0xf0] }
  0x46   :  { %v1184_v24 = vmul.f32 %v110_v22, %v105_v17  ;;  %v1186_v25 = vmul.f32 %v110_v22, %v107_v19  ;;  %v1188_v26 = vmul.f32 %v111_v23, %v106_v20  ;;  %v1190_v27 = vmul.f32 %v111_v23, %v108_v21  ;;  %623 = vmatpush.bf16.msrb.mxu3 %v895_v47  ;;  %v858_v20 = vld [vmem:[#allocation8 + $0x80] sm:$0xf]  ;;  %v969_v21 = vld [vmem:[#allocation8 + $0x84] sm:$0xf0]  ;;  %v968_v22 = vld [vmem:[#allocation8 + $0x84] sm:$0xf] }
  0x47   :  { %582 = vmatpush.bf16.msrb.mxu0 %v819_v39  ;;  %v799_v13 = vor.u32 %v952_v10, %v796_v12  ;;  %v867_v17 = vor.u32 %v971_v15, %v866_v14  ;;  %v871_v19 = vor.u32 %v970_v16, %v868_v18  ;;  %v859_v23 = vor.u32 %v969_v21, %v858_v20 }
  0x48   :  { %v118_v28 = vpack.c.bf16 %v1186_v25, %v1184_v24  ;;  %v119_v29 = vpack.c.bf16 %v1190_v27, %v1188_v26  ;;  %596 = vmatpush.bf16.msrb.mxu1 %v883_v57  ;;  %v414_v57 = vperm.slane %v412_v55, 0 }
  0x49   :  { %610 = vmatpush.bf16.msrb.mxu2 %v823_v41 }
  0x4a   :  { %326 = vmatmul.bf16.vlgmr.msra.gmra.mxu0 %v118_v28  ;;  %340 = vmatmul.bf16.vlgmr.msra.gmra.mxu1 %v119_v29 }
  0x4b   :  { %354 = vmatmul.bf16.vlgmr.msra.gmra.mxu2 %v118_v28  ;;  %368 = vmatmul.bf16.vlgmr.msra.gmra.mxu3 %v119_v29  ;;  %v860_v28 = vld [vmem:[#allocation8 + $0x88] sm:$0xf0] }
  0x4c   :  { %583 = vmatpush.bf16.msrb.mxu0 %v811_v51  ;;  %624 = vmatpush.bf16.msrb.mxu3 %v887_v59  ;;  %v863_v29 = vor.u32 %v968_v22, %v860_v28 }
  0x4d   :  { %611 = vmatpush.bf16.msrb.mxu2 %v815_v53  ;;  %597 = vmatpush.bf16.msrb.mxu1 %v875_v5 }
  0x50   :  { %584 = vmatpush.bf16.msrb.mxu0 %v803_v63  ;;  %625 = vmatpush.bf16.msrb.mxu3 %v879_v7 }
  0x51   :  { %612 = vmatpush.bf16.msrb.mxu2 %v807_v1  ;;  %598 = vmatpush.bf16.msrb.mxu1 %v867_v17 }
  0x54   :  { %585 = vmatpush.bf16.msrb.mxu0 %v795_v11  ;;  %626 = vmatpush.bf16.msrb.mxu3 %v871_v19 }
  0x55   :  { %613 = vmatpush.bf16.msrb.mxu2 %v799_v13  ;;  %599 = vmatpush.bf16.msrb.mxu1 %v859_v23 }
  0x58   :  { %627 = vmatpush.bf16.msrb.mxu3 %v863_v29 }
  0xc7   :  { %v327_v31 = vpop.f32.mrf.mxu0  ;;  %v341_v32 = vpop.f32.mrf.mxu1 }
  0xc8   :  { %v328_v34 = vadd.f32 %v327_v31, %v154_v33 }
  0xca   :  { %v342_v39 = vadd.f32 %v341_v32, %v328_v34 }
  0xcc   :  { %v374_v44 = vmax.f32 %v342_v39, 0.0 }
  0xce   :  { %v355_v35 = vpop.f32.mrf.mxu2  ;;  %v369_v36 = vpop.f32.mrf.mxu3 }
  0xcf   :  { %v329_v38 = vpop.f32.mrf.mxu0  ;;  %v343_v41 = vpop.f32.mrf.mxu1  ;;  %v356_v43 = vadd.f32 %v355_v35, %v155_v37 }
  0xd0   :  { %v330_v40 = vadd.f32 %v329_v38, %v154_v33 }
  0xd1   :  { %v370_v48 = vadd.f32 %v369_v36, %v356_v43 }
  0xd2   :  { %v344_v42 = vadd.f32 %v343_v41, %v330_v40 }
  0xd3   :  { %v375_v52 = vmax.f32 %v370_v48, 0.0 }
  0xd4   :  { %v376_v45 = vmax.f32 %v344_v42, 0.0 }
  0xd6   :  { %v378_v46 = vpack.c.bf16 %v376_v45, %v374_v44  ;;  %v357_v47 = vpop.f32.mrf.mxu2  ;;  %v371_v50 = vpop.f32.mrf.mxu3 }
  0xd7   :  { %v358_v49 = vadd.f32 %v357_v47, %v155_v37 }
  0xd8   :  { %586 = vmatmul.bf16.vlgmr.msrb.gmra.mxu0 %v378_v46  ;;  %614 = vmatmul.bf16.vlgmr.msrb.gmra.mxu2 %v378_v46 }
  0xd9   :  { %v372_v51 = vadd.f32 %v371_v50, %v358_v49 }
  0xdb   :  { %v377_v53 = vmax.f32 %v372_v51, 0.0 }
  0xdd   :  { %v379_v54 = vpack.c.bf16 %v377_v53, %v375_v52 }
  0xdf   :  { %600 = vmatmul.bf16.vlgmr.msrb.gmra.mxu1 %v379_v54  ;;  %628 = vmatmul.bf16.vlgmr.msrb.gmra.mxu3 %v379_v54 }
 0x155   :  { %v587_v56 = vpop.f32.mrf.mxu0 }
 0x156   :  { %v588_v58 = vadd.f32 %v587_v56, %v414_v57 }
 0x15b   :  { %v615_v60 = vpop.f32.mrf.mxu2 }
 0x15c   :  { %v601_v59 = vpop.f32.mrf.mxu1  ;;  %v616_v1 = vadd.f32 %v615_v60, %v415_v62 }
 0x15d   :  { %v602_v61 = vadd.f32 %v601_v59, %v588_v58  ;;  %v589_v0 = vpop.f32.mrf.mxu0 }
 0x15e   :  { %v590_v3 = vadd.f32 %v589_v0, %v414_v57 }
 0x15f   :  { %v634_v63 = vadd.f32 %v602_v61, %v1184_v24 }
 0x161   :  { %638 = vst [vmem:[#allocation10] sm:$0xff] %v634_v63 }
 0x162   :  { %v629_v2 = vpop.f32.mrf.mxu3 }
 0x163   :  { %v630_v4 = vadd.f32 %v629_v2, %v616_v1  ;;  %v617_v8 = vpop.f32.mrf.mxu2 }
 0x164   :  { %v603_v5 = vpop.f32.mrf.mxu1  ;;  %v618_v10 = vadd.f32 %v617_v8, %v415_v62 }
 0x165   :  { %v635_v6 = vadd.f32 %v630_v4, %v1188_v26  ;;  %v604_v7 = vadd.f32 %v603_v5, %v590_v3 }
 0x167   :  { %639 = vst [vmem:[#allocation10 + $0x8] sm:$0xff] %v635_v6  ;;  %v636_v9 = vadd.f32 %v604_v7, %v1186_v25 }
 0x169   :  { %640 = vst [vmem:[#allocation10 + $0x10] sm:$0xff] %v636_v9 }
 0x16a   :  { %v631_v11 = vpop.f32.mrf.mxu3 }
 0x16b   :  { %v632_v24 = vadd.f32 %v631_v11, %v618_v10 }
 0x16d   :  { %v637_v12 = vadd.f32 %v632_v24, %v1190_v27 }
 0x16f   :  { %641 = vst [vmem:[#allocation10 + $0x18] sm:$0xff] %v637_v12 }
 0x170   :  { %654 = dma.vmem_to_hbm [thread:$0]  %s647_s20, 512, %s649_s23, [#allocation4], %s1127_s7, %s1127_s7, %s1128_s8  }
 0x171   :  { %1123 = dma.done.wait [#allocation4], 512  }
 0x172   :  { %1124 = vsyncadd [#allocation4], 4294966784 }
 0x173   :  { %659 = vsyncpa [#allocation3], 1 }
 0x174   :  { %660 = vsyncpa [#allocation6], 1 }
 0x175   :  { %661 = vsyncpa [#allocation9], 1 }
 0x176   :  { %662 = vsyncpa [#allocation4], 1 }

</bundles_post_ra>
